<compile_context>
chip_gen: v5e
topology: v5e:2x2
jax: 0.10.0
libtpu: 0.0.40
codegen_flags: <defaults>
</compile_context>

<pallas_src>
import jax
import jax.numpy as jnp
from jax.experimental import pallas as pl
from jax.experimental.pallas import tpu as pltpu

_OUT_LANES = 128  # lane-dense output block width


def _round_up(x, m):
    return ((x + m - 1) // m) * m


def _leaky_relu(x, slope=0.2):
    return jnp.where(x > 0, x, slope * x)


def discriminator_kernel(x_ref, w1_ref, b1_ref, w2_ref, b2_ref, w3t_ref, b3_ref, o_ref):
    # One batch tile (TM rows) per grid step; weights resident across steps.
    x = x_ref[...]                                                  # (TM, D)
    h1 = jnp.dot(x, w1_ref[...], preferred_element_type=jnp.float32) + b1_ref[...]
    h1 = _leaky_relu(h1)                                            # (TM, 2*hid)
    h2 = jnp.dot(h1, w2_ref[...], preferred_element_type=jnp.float32) + b2_ref[...]
    h2 = _leaky_relu(h2)                                            # (TM, hid)
    # N=1 final layer: VPU multiply + lane reduce instead of a 1-column MXU matmul.
    h3 = jnp.sum(h2 * w3t_ref[...], axis=-1, keepdims=True) + b3_ref[...]   # (TM, 1)
    y = jax.nn.sigmoid(h3)
    # Lane-dense store: broadcast the per-row scalar across the 128-lane block.
    o_ref[...] = jnp.broadcast_to(y, o_ref.shape)                   # (TM, 128)


def discriminator_forward(x_nchw, params, *, tm=None):
    """x_nchw: (B, C, H, W) float32. params: dict of weights/biases."""
    B = x_nchw.shape[0]
    x_flat = x_nchw.reshape(B, -1).astype(jnp.float32)              # glue reshape
    D = x_flat.shape[1]

    # Batch tile: 128 rows when the batch is large, else the smallest multiple
    # of 8 covering B (sublane alignment).
    if tm is None:
        tm = 128 if B >= 128 else _round_up(B, 8)
    B_pad = _round_up(B, tm)
    if B_pad != B:
        x_flat = jnp.pad(x_flat, ((0, B_pad - B), (0, 0)))

    w1, b1 = params["w1"], params["b1"]
    w2, b2 = params["w2"], params["b2"]
    w3, b3 = params["w3"], params["b3"]
    w3t = w3.T                                                      # (1, hid) row vector

    H1 = w1.shape[1]
    H2 = w2.shape[1]
    grid = (B_pad // tm,)

    out = pl.pallas_call(
        discriminator_kernel,
        out_shape=jax.ShapeDtypeStruct((B_pad, _OUT_LANES), jnp.float32),
        grid=grid,
        in_specs=[
            pl.BlockSpec((tm, D), lambda i: (i, 0)),    # x: tiled on batch
            pl.BlockSpec((D, H1), lambda i: (0, 0)),    # w1: resident
            pl.BlockSpec((1, H1), lambda i: (0, 0)),    # b1
            pl.BlockSpec((H1, H2), lambda i: (0, 0)),   # w2: resident
            pl.BlockSpec((1, H2), lambda i: (0, 0)),    # b2
            pl.BlockSpec((1, H2), lambda i: (0, 0)),    # w3^T (row vector)
            pl.BlockSpec((1, 1), lambda i: (0, 0)),     # b3 (scalar)
        ],
        out_specs=pl.BlockSpec((tm, _OUT_LANES), lambda i: (i, 0)),
        compiler_params=pltpu.CompilerParams(
            dimension_semantics=("parallel",),          # v7x: shard batch tiles across TCs
        ),
    )(x_flat, w1, b1, w2, b2, w3t, b3)

    # Drop padding rows and the broadcast lanes.
    return out[:B, :1]


def init_params(key, in_features, hidden_size):
    """Deterministic init mimicking PyTorch nn.Linear default (U(-1/sqrt(fan_in), +))."""
    dims = [(in_features, hidden_size * 2),
            (hidden_size * 2, hidden_size),
            (hidden_size, 1)]
    params = {}
    keys = jax.random.split(key, 2 * len(dims))
    for i, (fan_in, fan_out) in enumerate(dims):
        bound = 1.0 / jnp.sqrt(jnp.float32(fan_in))
        w = jax.random.uniform(keys[2 * i], (fan_in, fan_out),
                               minval=-bound, maxval=bound, dtype=jnp.float32)
        b = jax.random.uniform(keys[2 * i + 1], (1, fan_out),
                               minval=-bound, maxval=bound, dtype=jnp.float32)
        params[f"w{i + 1}"] = w
        params[f"b{i + 1}"] = b
    return params


def reference_forward(x_nchw, params):
    """Pure-JAX reference for sanity checking."""
    x = x_nchw.reshape(x_nchw.shape[0], -1)
    h = x @ params["w1"] + params["b1"]
    h = jnp.where(h > 0, h, 0.2 * h)
    h = h @ params["w2"] + params["b2"]
    h = jnp.where(h > 0, h, 0.2 * h)
    h = h @ params["w3"] + params["b3"]
    return jax.nn.sigmoid(h)


if __name__ == "__main__":
    # Small shapes consistent with the module: img_shape=(1, 16, 16), hidden=32.
    B, C, H, W = 8, 1, 16, 16
    hidden_size = 32
    D = C * H * W

    key = jax.random.PRNGKey(0)
    kx, kp = jax.random.split(key)
    x = jax.random.normal(kx, (B, C, H, W), dtype=jnp.float32)
    params = init_params(kp, D, hidden_size)

    out = discriminator_forward(x, params)
    out = jax.block_until_ready(out)

    ref = reference_forward(x, params)
    assert out.shape == (B, 1)
    assert jnp.allclose(out, ref, atol=1e-5, rtol=1e-5), "mismatch vs reference"

    print("KERNEL_OK")
</pallas_src>

<mosaic_0001>
module attributes {stable_mosaic.version = 11 : i64} {
  func.func @discriminator_kernel(%arg0: i32, %arg1: memref<8x256xf32, #tpu.memory_space<vmem>>, %arg2: memref<256x64xf32, #tpu.memory_space<vmem>>, %arg3: memref<1x64xf32, #tpu.memory_space<vmem>>, %arg4: memref<64x32xf32, #tpu.memory_space<vmem>>, %arg5: memref<1x32xf32, #tpu.memory_space<vmem>>, %arg6: memref<1x32xf32, #tpu.memory_space<vmem>>, %arg7: memref<1x1xf32, #tpu.memory_space<vmem>>, %arg8: memref<8x128xf32, #tpu.memory_space<vmem>>) attributes {dimension_semantics = [#tpu.dimension_semantics<parallel>], iteration_bounds = array<i64: 1>, scalar_prefetch = 0 : i64, scratch_operands = 0 : i64, tpu.core_type = #tpu.core_type<tc>, window_params = [{transform_indices = @transform_0, window_bounds = array<i64: 8, 256>}, {pipeline_mode = #tpu.pipeline_mode<synchronous>, transform_indices = @transform_1, window_bounds = array<i64: 256, 64>}, {pipeline_mode = #tpu.pipeline_mode<synchronous>, transform_indices = @transform_2, window_bounds = array<i64: 1, 64>}, {pipeline_mode = #tpu.pipeline_mode<synchronous>, transform_indices = @transform_3, window_bounds = array<i64: 64, 32>}, {pipeline_mode = #tpu.pipeline_mode<synchronous>, transform_indices = @transform_4, window_bounds = array<i64: 1, 32>}, {pipeline_mode = #tpu.pipeline_mode<synchronous>, transform_indices = @transform_5, window_bounds = array<i64: 1, 32>}, {pipeline_mode = #tpu.pipeline_mode<synchronous>, transform_indices = @transform_6, window_bounds = array<i64: 1, 1>}, {transform_indices = @transform_7, window_bounds = array<i64: 8, 128>}]} {
    %c0 = arith.constant 0 : index
    %c0_0 = arith.constant 0 : index
    %0 = vector.load %arg1[%c0, %c0_0] : memref<8x256xf32, #tpu.memory_space<vmem>>, vector<8x256xf32>
    %c0_1 = arith.constant 0 : index
    %c0_2 = arith.constant 0 : index
    %1 = vector.load %arg2[%c0_1, %c0_2] : memref<256x64xf32, #tpu.memory_space<vmem>>, vector<256x64xf32>
    %cst = arith.constant dense<0.000000e+00> : vector<8x64xf32>
    %2 = tpu.matmul %0, %1, %cst {dimension_numbers = #tpu.dot_dimension_numbers<[1], [0], [0], [1], [0, 0, 1, 1], [], []>} : vector<8x256xf32>, vector<256x64xf32>, vector<8x64xf32> -> vector<8x64xf32>
    %c0_3 = arith.constant 0 : index
    %c0_4 = arith.constant 0 : index
    %3 = vector.load %arg3[%c0_3, %c0_4] : memref<1x64xf32, #tpu.memory_space<vmem>>, vector<1x64xf32>
    %4 = vector.broadcast %3 : vector<1x64xf32> to vector<8x64xf32>
    %5 = arith.addf %2, %4 : vector<8x64xf32>
    %cst_5 = arith.constant 0.000000e+00 : f32
    %6 = vector.broadcast %cst_5 : f32 to vector<8x64xf32>
    %7 = arith.cmpf ogt, %5, %6 : vector<8x64xf32>
    %cst_6 = arith.constant 2.000000e-01 : f32
    %8 = vector.broadcast %cst_6 : f32 to vector<8x64xf32>
    %9 = arith.mulf %8, %5 : vector<8x64xf32>
    %10 = arith.select %7, %5, %9 : vector<8x64xi1>, vector<8x64xf32>
    %c0_7 = arith.constant 0 : index
    %c0_8 = arith.constant 0 : index
    %11 = vector.load %arg4[%c0_7, %c0_8] : memref<64x32xf32, #tpu.memory_space<vmem>>, vector<64x32xf32>
    %cst_9 = arith.constant dense<0.000000e+00> : vector<8x32xf32>
    %12 = tpu.matmul %10, %11, %cst_9 {dimension_numbers = #tpu.dot_dimension_numbers<[1], [0], [0], [1], [0, 0, 1, 1], [], []>} : vector<8x64xf32>, vector<64x32xf32>, vector<8x32xf32> -> vector<8x32xf32>
    %c0_10 = arith.constant 0 : index
    %c0_11 = arith.constant 0 : index
    %13 = vector.load %arg5[%c0_10, %c0_11] : memref<1x32xf32, #tpu.memory_space<vmem>>, vector<1x32xf32>
    %14 = vector.broadcast %13 : vector<1x32xf32> to vector<8x32xf32>
    %15 = arith.addf %12, %14 : vector<8x32xf32>
    %cst_12 = arith.constant 0.000000e+00 : f32
    %16 = vector.broadcast %cst_12 : f32 to vector<8x32xf32>
    %17 = arith.cmpf ogt, %15, %16 : vector<8x32xf32>
    %cst_13 = arith.constant 2.000000e-01 : f32
    %18 = vector.broadcast %cst_13 : f32 to vector<8x32xf32>
    %19 = arith.mulf %18, %15 : vector<8x32xf32>
    %20 = arith.select %17, %15, %19 : vector<8x32xi1>, vector<8x32xf32>
    %c0_14 = arith.constant 0 : index
    %c0_15 = arith.constant 0 : index
    %21 = vector.load %arg6[%c0_14, %c0_15] : memref<1x32xf32, #tpu.memory_space<vmem>>, vector<1x32xf32>
    %22 = vector.broadcast %21 : vector<1x32xf32> to vector<8x32xf32>
    %23 = arith.mulf %20, %22 : vector<8x32xf32>
    %cst_16 = arith.constant dense<0.000000e+00> : vector<8xf32>
    %24 = vector.multi_reduction <add>, %23, %cst_16 [1] : vector<8x32xf32> to vector<8xf32>
    %25 = vector.shape_cast %24 : vector<8xf32> to vector<8x1xf32>
    %c0_17 = arith.constant 0 : index
    %c0_18 = arith.constant 0 : index
    %26 = vector.load %arg7[%c0_17, %c0_18] : memref<1x1xf32, #tpu.memory_space<vmem>>, vector<1x1xf32>
    %27 = vector.broadcast %26 : vector<1x1xf32> to vector<8x1xf32>
    %28 = arith.addf %25, %27 : vector<8x1xf32>
    %29 = arith.negf %28 : vector<8x1xf32>
    %30 = math.exp %29 : vector<8x1xf32>
    %cst_19 = arith.constant 1.000000e+00 : f32
    %31 = vector.broadcast %cst_19 : f32 to vector<8x1xf32>
    %32 = arith.addf %31, %30 : vector<8x1xf32>
    %33 = arith.divf %31, %32 : vector<8x1xf32>
    %34 = vector.shape_cast %33 : vector<8x1xf32> to vector<8x1xf32>
    %35 = vector.broadcast %34 : vector<8x1xf32> to vector<8x128xf32>
    %c0_20 = arith.constant 0 : index
    %c0_21 = arith.constant 0 : index
    %36 = vector.load %arg8[%c0_20, %c0_21] : memref<8x128xf32, #tpu.memory_space<vmem>>, vector<8x128xf32>
    tpu.vector_store %arg8[%c0_20, %c0_21], %35 {strides = array<i32>} : memref<8x128xf32, #tpu.memory_space<vmem>>, vector<8x128xf32>,
    return
  }
  func.func @transform_0(%arg0: i32) -> (i32, i32) {
    %c0_i32 = arith.constant 0 : i32
    %c0_i32_0 = arith.constant 0 : i32
    return %arg0, %c0_i32 : i32, i32
  }
  func.func @transform_1(%arg0: i32) -> (i32, i32) {
    %c0_i32 = arith.constant 0 : i32
    %c0_i32_0 = arith.constant 0 : i32
    %c0_i32_1 = arith.constant 0 : i32
    return %c0_i32, %c0_i32_0 : i32, i32
  }
  func.func @transform_2(%arg0: i32) -> (i32, i32) {
    %c0_i32 = arith.constant 0 : i32
    %c0_i32_0 = arith.constant 0 : i32
    %c0_i32_1 = arith.constant 0 : i32
    return %c0_i32, %c0_i32_0 : i32, i32
  }
  func.func @transform_3(%arg0: i32) -> (i32, i32) {
    %c0_i32 = arith.constant 0 : i32
    %c0_i32_0 = arith.constant 0 : i32
    %c0_i32_1 = arith.constant 0 : i32
    return %c0_i32, %c0_i32_0 : i32, i32
  }
  func.func @transform_4(%arg0: i32) -> (i32, i32) {
    %c0_i32 = arith.constant 0 : i32
    %c0_i32_0 = arith.constant 0 : i32
    %c0_i32_1 = arith.constant 0 : i32
    return %c0_i32, %c0_i32_0 : i32, i32
  }
  func.func @transform_5(%arg0: i32) -> (i32, i32) {
    %c0_i32 = arith.constant 0 : i32
    %c0_i32_0 = arith.constant 0 : i32
    %c0_i32_1 = arith.constant 0 : i32
    return %c0_i32, %c0_i32_0 : i32, i32
  }
  func.func @transform_6(%arg0: i32) -> (i32, i32) {
    %c0_i32 = arith.constant 0 : i32
    %c0_i32_0 = arith.constant 0 : i32
    %c0_i32_1 = arith.constant 0 : i32
    return %c0_i32, %c0_i32_0 : i32, i32
  }
  func.func @transform_7(%arg0: i32) -> (i32, i32) {
    %c0_i32 = arith.constant 0 : i32
    %c0_i32_0 = arith.constant 0 : i32
    return %arg0, %c0_i32 : i32, i32
  }
}

</mosaic_0001>

<bundles_post_ra>
// kernel: tpu_custom_call.1
= control target key start
LH: loop header
LB: loop body
LE: loop exit
PB: predicated region body
PF: predicated region fallthrough
CT: control target
= control target key end

     0   :  { %s426_s0 = inlined_call_operand.vmem [shape: f32[8,256], index: 0, kind: input, shape index: {}]   ;;  %s427_s1 = inlined_call_operand.vmem [shape: f32[256,64], index: 1, kind: input, shape index: {}]   ;;  %s428_s2 = inlined_call_operand.vmem [shape: f32[1,64], index: 2, kind: input, shape index: {}]   ;;  %s429_s3 = inlined_call_operand.vmem [shape: f32[64,32], index: 3, kind: input, shape index: {}]   ;;  %s430_s4 = inlined_call_operand.vmem [shape: f32[1,32], index: 4, kind: input, shape index: {}]   ;;  %s431_s5 = inlined_call_operand.vmem [shape: f32[1,32], index: 5, kind: input, shape index: {}]   ;;  %s432_s6 = inlined_call_operand.<no memory space> [shape: f32[1,1], index: 6, kind: input, shape index: {}]   ;;  %s433_s7 = inlined_call_operand.hbm [shape: f32[8,128], index: 7, kind: output, shape index: {}]  }
   0x1   :  { %v12_v0 = vstv %s432_s6 }
   0x2   :  { %13 = vst [vmem:[#allocation2] sm:$0x1] %v12_v0 }
   0x3   :  { %v46_v1 = vld [vmem:[%s427_s1 + $0x78] sm:$0xff]  ;;  %v45_v2 = vld [vmem:[%s427_s1 + $0x70] sm:$0xff]  ;;  %v44_v5 = vld [vmem:[%s427_s1 + $0x68] sm:$0xff] }
   0x4   :  { %v62_v3 = vld [vmem:[%s427_s1 + $0xf8] sm:$0xff]  ;;  %67 = vmatpush.msra.mxu0 %v46_v1  ;;  %v61_v4 = vld [vmem:[%s427_s1 + $0xf0] sm:$0xff]  ;;  %v60_v6 = vld [vmem:[%s427_s1 + $0xe8] sm:$0xff] }
   0x5   :  { %87 = vmatpush.msra.mxu1 %v62_v3  ;;  %v43_v7 = vld [vmem:[%s427_s1 + $0x60] sm:$0xff]  ;;  %v42_v9 = vld [vmem:[%s427_s1 + $0x58] sm:$0xff]  ;;  %v41_v11 = vld [vmem:[%s427_s1 + $0x50] sm:$0xff] }
   0x6   :  { %68 = vmatpush.msra.mxu0 %v45_v2  ;;  %v59_v8 = vld [vmem:[%s427_s1 + $0xe0] sm:$0xff]  ;;  %v58_v10 = vld [vmem:[%s427_s1 + $0xd8] sm:$0xff]  ;;  %v57_v12 = vld [vmem:[%s427_s1 + $0xd0] sm:$0xff] }
   0x7   :  { %88 = vmatpush.msra.mxu1 %v61_v4  ;;  %v40_v13 = vld [vmem:[%s427_s1 + $0x48] sm:$0xff]  ;;  %v39_v15 = vld [vmem:[%s427_s1 + $0x40] sm:$0xff]  ;;  %v117_v16 = vld [vmem:[%s429_s3 + $0x38] sm:$0xff] }
   0x8   :  { %69 = vmatpush.msra.mxu0 %v44_v5  ;;  %v56_v14 = vld [vmem:[%s427_s1 + $0xc8] sm:$0xff]  ;;  %v116_v17 = vld [vmem:[%s429_s3 + $0x30] sm:$0xff]  ;;  %v38_v18 = vld [vmem:[%s427_s1 + $0x38] sm:$0xff]  ;;  %134 = vmatpush.msra.mxu2 %v117_v16 }
   0x9   :  { %89 = vmatpush.msra.mxu1 %v60_v6  ;;  %v55_v19 = vld [vmem:[%s427_s1 + $0xc0] sm:$0xff]  ;;  %v115_v20 = vld [vmem:[%s429_s3 + $0x28] sm:$0xff]  ;;  %v54_v21 = vld [vmem:[%s427_s1 + $0xb8] sm:$0xff] }
   0xa   :  { %70 = vmatpush.msra.mxu0 %v43_v7  ;;  %135 = vmatpush.msra.mxu2 %v116_v17 }
   0xb   :  { %90 = vmatpush.msra.mxu1 %v59_v8 }
   0xc   :  { %71 = vmatpush.msra.mxu0 %v42_v9 }
   0xd   :  { %91 = vmatpush.msra.mxu1 %v58_v10 }
   0xe   :  { %72 = vmatpush.msra.mxu0 %v41_v11 }
   0xf   :  { %92 = vmatpush.msra.mxu1 %v57_v12 }
  0x10   :  { %73 = vmatpush.msra.mxu0 %v40_v13 }
  0x11   :  { %93 = vmatpush.msra.mxu1 %v56_v14 }
  0x12   :  { %14 = vsyncpa [#allocation4], 0  ;;  %74 = vmatpush.msra.mxu0 %v39_v15  ;;  %v114_v22 = vld [vmem:[%s429_s3 + $0x20] sm:$0xff]  ;;  %v37_v23 = vld [vmem:[%s427_s1 + $0x30] sm:$0xff]  ;;  %136 = vmatpush.msra.mxu2 %v115_v20  ;;  %vm122_vm1 = vcmask 523264   ;;  %vm154_vm3 = vcmask 261120  }
  0x13   :  { %94 = vmatpush.msra.mxu1 %v55_v19  ;;  %v53_v24 = vld [vmem:[%s427_s1 + $0xb0] sm:$0xff]  ;;  %v36_v25 = vld [vmem:[%s427_s1 + $0x28] sm:$0xff]  ;;  %v35_v27 = vld [vmem:[%s427_s1 + $0x20] sm:$0xff]  ;;  %v243_v58 = vmov 0   ;;  %s195_s18 = sshll.u32 %s433_s7, 4  ;;  %s196_s18 = int_to_ptr.hbm [resolvable:$true] %s195_s18 }
  0x14   :  { %75 = vmatpush.msra.mxu0 %v38_v18  ;;  %v52_v26 = vld [vmem:[%s427_s1 + $0xa8] sm:$0xff]  ;;  %137 = vmatpush.msra.mxu2 %v114_v22  ;;  %v51_v28 = vld [vmem:[%s427_s1 + $0xa0] sm:$0xff]  ;;  %v34_v29 = vld [vmem:[%s427_s1 + $0x18] sm:$0xff] }
  0x15   :  { %95 = vmatpush.msra.mxu1 %v54_v21  ;;  %v50_v30 = vld [vmem:[%s427_s1 + $0x98] sm:$0xff]  ;;  %v33_v31 = vld [vmem:[%s427_s1 + $0x10] sm:$0xff]  ;;  %v32_v33 = vld [vmem:[%s427_s1 + $0x8] sm:$0xff]  ;;  %208 = vset.pattern.permute.xlu0 %v243_v58 }
  0x16   :  { %76 = vmatpush.msra.mxu0 %v37_v23  ;;  %v49_v32 = vld [vmem:[%s427_s1 + $0x90] sm:$0xff]  ;;  %v48_v34 = vld [vmem:[%s427_s1 + $0x88] sm:$0xff]  ;;  %v31_v35 = vld [vmem:[%s427_s1] sm:$0xff] }
  0x17   :  { %96 = vmatpush.msra.mxu1 %v53_v24  ;;  %v47_v36 = vld [vmem:[%s427_s1 + $0x80] sm:$0xff]  ;;  %v30_v38 = vld [vmem:[%s426_s0 + $0x8] sm:$0xff]  ;;  %v113_v39 = vld [vmem:[%s429_s3 + $0x18] sm:$0xff] }
  0x18   :  { %77 = vmatpush.msra.mxu0 %v36_v25  ;;  %v29_v37 = vld [vmem:[%s426_s0] sm:$0xff]  ;;  %138 = vmatpush.msra.mxu2 %v113_v39  ;;  %v112_v40 = vld [vmem:[%s429_s3 + $0x10] sm:$0xff]  ;;  %v111_v41 = vld [vmem:[%s429_s3 + $0x8] sm:$0xff] }
  0x19   :  { %97 = vmatpush.msra.mxu1 %v52_v26  ;;  %v110_v42 = vld [vmem:[%s429_s3] sm:$0xff] }
  0x1a   :  { %78 = vmatpush.msra.mxu0 %v35_v27  ;;  %139 = vmatpush.msra.mxu2 %v112_v40  ;;  %v209_v43 = vld [vmem:[%s428_s2] ss:$0 sm:$0xff]  ;;  %s244_s2 = smov [#allocation3]  }
  0x1b   :  { %98 = vmatpush.msra.mxu1 %v51_v28  ;;  %v210_v50 = vld [vmem:[%s430_s4] ss:$0 sm:$0xff]  ;;  %s193_s4 = sshll.u32 %s244_s2, 4  ;;  %s194_s4 = int_to_ptr.vmem [resolvable:$true] %s193_s4 }
  0x1c   :  { %79 = vmatpush.msra.mxu0 %v34_v29  ;;  %140 = vmatpush.msra.mxu2 %v111_v41  ;;  %v211_v53 = vld [vmem:[%s431_s5] ss:$0 sm:$0xff] }
  0x1d   :  { %99 = vmatpush.msra.mxu1 %v50_v30  ;;  %v212_v59 = vld [vmem:[#allocation2] ss:$0 sm:$0xff] }
  0x1e   :  { %80 = vmatpush.msra.mxu0 %v33_v31  ;;  %141 = vmatpush.msra.mxu2 %v110_v42 }
  0x1f   :  { %100 = vmatpush.msra.mxu1 %v49_v32 }
  0x20   :  { %81 = vmatpush.msra.mxu0 %v32_v33 }
  0x21   :  { %101 = vmatpush.msra.mxu1 %v48_v34 }
  0x22   :  { %82 = vmatpush.msra.mxu0 %v31_v35 }
  0x23   :  { %102 = vmatpush.msra.mxu1 %v47_v36  ;;  %83 = vmatmul.f32.vlgmr.msra.gmra.mxu0 %v29_v37 }
  0x24   :  { %103 = vmatmul.f32.vlgmr.msra.gmra.mxu1 %v30_v38 }
  0xa0   :  { %v84_v44 = vpop.f32.mrf.mxu0 }
  0xa1   :  { %v104_v45 = vpop.f32.mrf.mxu1  ;;  %v85_v46 = vadd.f32 %v209_v43, %v84_v44 }
  0xa3   :  { %v105_v47 = vadd.f32 %v104_v45, %v85_v46 }
  0xa5   :  { %v108_v48 = vmul.f32 0.2, %v105_v47  ;;  %vm107_vm0 = vcmp.gt.f32.partialorder %v105_v47, 0.0 }
  0xa7   :  { %v109_v49 = vsel %vm107_vm0, %v105_v47, %v108_v48 }
  0xa8   :  { %204 = vmatmul.msk.f32.vlgmr.msra.gmra.mxu2 %vm122_vm1, %v109_v49 }
 0x12b   :  { %v143_v51 = vpop.f32.mrf.mxu2 }
 0x12c   :  { %v144_v52 = vadd.f32 %v210_v50, %v143_v51 }
 0x12e   :  { %v147_v54 = vmul.f32 0.2, %v144_v52  ;;  %vm146_vm2 = vcmp.gt.f32.partialorder %v144_v52, 0.0 }
 0x130   :  { %v148_v55 = vsel %vm146_vm2, %v144_v52, %v147_v54 }
 0x131   :  { %v153_v56 = vmul.f32 %v211_v53, %v148_v55 }
 0x133   :  { %v155_v57 = vsel %vm154_vm3, %v153_v56, 0.0 }
 0x134   :  { %156 = vadd.xlane.f32.xlu0 %v155_v57 }
 0x1a7   :  { %v157_v60 = vpop.xlane.xlu0 %156 }
 0x1a8   :  { %v162_v61 = vadd.f32 %v212_v59, %v157_v60 }
 0x1aa   :  { %v205_v62 = vmul.f32 -1.442695, %v162_v61 }
 0x1ac   :  { %213 = vpow2.f32 %v205_v62 }
 0x1b2   :  { %v214_v63 = vpop.eup %213 }
 0x1b3   :  { %v166_v0 = vadd.f32 1.0, %v214_v63 }
 0x1b5   :  { %215 = vrcp.f32 %v166_v0  ;;  %v178_v4 = vand.u32 2147483648, %v166_v0  ;;  %v176_v6 = vand.u32 2147483647, %v166_v0  ;;  %vm172_vm5 = vweird.f32 %v166_v0 }
 0x1b7   :  { %v179_v8 = vor.u32 1.1754944e-38, %v178_v4  ;;  %vm177_vm7 = vcmp.eq.f32.partialorder %v176_v6, 8.507059e+37 }
 0x1bb   :  { %v216_v1 = vpop.eup %215 }
 0x1bc   :  { %v168_v2 = vmul.f32 %v216_v1, %v166_v0  ;;  %vm173_vm4 = vweird.f32 %v216_v1 }
 0x1bd   :  { %vm174_vm6 = vmor %vm172_vm5, %vm173_vm4 }
 0x1be   :  { %v169_v3 = vsub.f32 1.0, %v168_v2 }
 0x1c0   :  { %v170_v5 = vmul.f32 %v216_v1, %v169_v3 }
 0x1c2   :  { %v171_v7 = vadd.f32 %v216_v1, %v170_v5 }
 0x1c4   :  { %v175_v9 = vsel %vm174_vm6, %v216_v1, %v171_v7 }
 0x1c5   :  { %v180_v10 = vsel %vm177_vm7, %v179_v8, %v175_v9 }
 0x1c6   :  { %184 = vperm.xlu0 %208, %v180_v10  }
 0x238   :  { %v185_v11 = vpop.permute.xlu0 %184 }
 0x239   :  { %187 = vst [vmem:[#allocation3] sm:$0xff] %v185_v11 }
 0x23a   :  { %198 = dma.vmem_to_hbm [thread:$0]  %s194_s4, 128, %s196_s18, [#allocation4]  }
 0x23b   :  { %241 = dma.done.wait [#allocation4], 128  }
 0x23c   :  { %242 = vsyncadd [#allocation4], 4294967168 }
 0x23d   :  { %203 = vsyncpa [#allocation4], 1 }

</bundles_post_ra>
